<compile_context>
chip_gen: v6e
topology: v6e:2x2x1
jax: 0.10.0
libtpu: 0.0.40
codegen_flags: <defaults>
</compile_context>

<pallas_src>
import jax
import jax.numpy as jnp
from jax.experimental import pallas as pl
from jax.experimental.pallas import tpu as pltpu


def _round_up(n, m):
    return ((n + m - 1) // m) * m


# ----------------------------------------------------------------------------
# Kernel
# ----------------------------------------------------------------------------
def mtl_fused_kernel(x_ref,
                     wA_ref, bA_ref,      # block-diag rep of fc1
                     wB_ref, bB_ref,      # block-diag rep of fc2
                     wC_ref, bC_ref,      # block-diag rep of (fc3, fc5) over groups
                     wD_ref, bD_ref,      # block-diag rep of (fc4, fc6) over groups
                     out_ref):
    x = x_ref[...]                                            # [TB, IN*G]

    # fc1 -> relu -> (Multiply [x,x]) twice  ==>  relu(fc1(x)) ** 4
    wA = wA_ref[...]
    h1 = jnp.dot(x.astype(wA.dtype), wA,
                 preferred_element_type=jnp.float32) + bA_ref[...]
    h1 = jnp.maximum(h1, 0.0)
    h1 = h1 * h1            # mult1([x, x])
    h1 = h1 * h1            # mult2([x, x])

    # fc2 -> relu (shared trunk output)
    wB = wB_ref[...]
    h2 = jnp.dot(h1.astype(wB.dtype), wB,
                 preferred_element_type=jnp.float32) + bB_ref[...]
    h2 = jnp.maximum(h2, 0.0)                                 # [TB, W*G]

    # Fused heads: hc = [h2*h2 | h2]; the pack-time wC row layout absorbs this ordering,
    # so the concat is a lane-block copy (vreg-aligned for W*G multiples of 128).
    hc = jnp.concatenate([h2 * h2, h2], axis=-1)              # [TB, 2*W*G]
    wC = wC_ref[...]
    h3 = jnp.dot(hc.astype(wC.dtype), wC,
                 preferred_element_type=jnp.float32) + bC_ref[...]
    h3 = jnp.maximum(h3, 0.0)

    wD = wD_ref[...]
    out = jnp.dot(h3.astype(wD.dtype), wD,
                  preferred_element_type=jnp.float32) + bD_ref[...]
    out_ref[...] = out.astype(out_ref.dtype)                  # [TB, (OUT1+OUT2)*G]


# ----------------------------------------------------------------------------
# Wrapper
# ----------------------------------------------------------------------------
def neural_network_mtl(x, packed, *, block_b=4096):
    """x: [B, INPUT_dim] float32. packed: dict from pack_params(). Returns (value, grad)."""
    B, in_dim = x.shape
    G = packed["groups"]
    o1, o2 = packed["out1"], packed["out2"]
    out_dim = o1 + o2
    assert packed["wA"].shape[0] == in_dim * G, "packed weights don't match input dim / groups"

    # Packed-row tiling: G batch rows per packed row.  Tile is a multiple of 8 (f32
    # sublane), capped at block_b original rows, and capped so the grid has >=2 steps
    # whenever possible (lets "parallel" shard across v7x's 2 TensorCores).
    rows = pl.cdiv(B, G)                                   # packed rows needed
    tb_cap = _round_up(max(block_b // G, 1), 8)            # requested packed-row tile
    tb_two = max(8, _round_up(pl.cdiv(rows, 2), 8))        # tile giving >=2 grid steps
    tb = max(8, min(tb_cap, tb_two, _round_up(rows, 8)))
    rows_p = _round_up(rows, tb)
    Bp = rows_p * G
    grid = (rows_p // tb,)

    if Bp != B:
        x = jnp.pad(x, ((0, Bp - B), (0, 0)))
    xg = x.reshape(rows_p, in_dim * G)                     # row-major, zero-cost pack

    weights = (packed["wA"], packed["bA"], packed["wB"], packed["bB"],
               packed["wC"], packed["bC"], packed["wD"], packed["bD"])

    def resident(arr):
        # Full-array block, same block every grid step -> DMAed once, VMEM-resident.
        return pl.BlockSpec(arr.shape, lambda i: (0, 0))

    flops = 2 * rows_p * sum(int(w.shape[0]) * int(w.shape[1])
                             for w in (packed["wA"], packed["wB"],
                                       packed["wC"], packed["wD"]))
    bytes_accessed = (int(xg.size) * xg.dtype.itemsize
                      + sum(int(w.size) * w.dtype.itemsize for w in weights)
                      + rows_p * out_dim * G * 4)

    fused = pl.pallas_call(
        mtl_fused_kernel,
        out_shape=jax.ShapeDtypeStruct((rows_p, out_dim * G), jnp.float32),
        grid=grid,
        in_specs=[pl.BlockSpec((tb, in_dim * G), lambda i: (i, 0))]
                 + [resident(w) for w in weights],
        out_specs=pl.BlockSpec((tb, out_dim * G), lambda i: (i, 0)),
        compiler_params=pltpu.CompilerParams(
            dimension_semantics=("parallel",)),
        cost_estimate=pl.CostEstimate(flops=flops, transcendentals=0,
                                      bytes_accessed=bytes_accessed),
    )(xg, *weights)

    out = fused.reshape(Bp, out_dim)                       # row-major, zero-cost unpack
    return out[:B, :o1], out[:B, o1:]


# ----------------------------------------------------------------------------
# Parameter construction (PyTorch-equivalent init) + group-packed weights
# ----------------------------------------------------------------------------
def xavier_normal(key, fan_out, fan_in):
    # nn.init.xavier_normal_ on a (fan_out, fan_in) weight
    std = (2.0 / (fan_in + fan_out)) ** 0.5
    return std * jax.random.normal(key, (fan_out, fan_in), dtype=jnp.float32)


def init_params(key, input_dim, output1_dim, output2_dim, width):
    keys = jax.random.split(key, 12)
    dims = [
        ("w1", "b1", width, input_dim),
        ("w2", "b2", width, width),
        ("w3", "b3", width, width),
        ("w4", "b4", output1_dim, width),
        ("w5", "b5", width, width),
        ("w6", "b6", output2_dim, width),
    ]
    params = {}
    for i, (wn, bn, fo, fi) in enumerate(dims):
        w = xavier_normal(keys[2 * i], fo, fi)              # PyTorch layout [out, in]
        bound = 1.0 / (fi ** 0.5)                           # default nn.Linear bias init
        b = jax.random.uniform(keys[2 * i + 1], (fo,), jnp.float32, -bound, bound)
        params[wn] = jnp.transpose(w)                        # store as [in, out]
        params[bn] = b.reshape(1, fo)                        # [1, out] for broadcast
    return params


def _blockdiag_rep(w, g_count):
    """Replicate w [K,N] block-diagonally g_count times -> [K*G, N*G] (zeros elsewhere)."""
    K, N = w.shape
    out = jnp.zeros((K * g_count, N * g_count), jnp.float32)
    for g in range(g_count):
        out = out.at[g * K:(g + 1) * K, g * N:(g + 1) * N].set(w)
    return out


def pack_params(params, out1_dim, out2_dim, *, groups=4, weight_dtype=jnp.float32):
    """Build the group-packed block-diagonal weight set consumed by the kernel.

    groups=4 targets v6e/v7x (256-wide MXU); groups=2 is the v5e-friendly setting.
    Off-diagonal blocks are exact zeros, so groups cannot leak into each other.
    """
    G = groups
    W = params["w2"].shape[0]
    OUT = out1_dim + out2_dim

    wA = _blockdiag_rep(params["w1"], G)                    # [IN*G, W*G]
    bA = jnp.tile(params["b1"], (1, G))                     # [1, W*G]
    wB = _blockdiag_rep(params["w2"], G)                    # [W*G, W*G]
    bB = jnp.tile(params["b2"], (1, G))

    # hc column layout: [0, W*G) = h2^2 (group g at g*W), [W*G, 2*W*G) = h2 (group g at W*G+g*W)
    # h3 column layout: group g occupies [g*2W, (g+1)*2W): first W = fc3 out, next W = fc5 out
    wC = jnp.zeros((2 * W * G, 2 * W * G), jnp.float32)
    bC = jnp.zeros((1, 2 * W * G), jnp.float32)
    # out column layout: group g occupies [g*OUT, (g+1)*OUT): first OUT1 = value, next OUT2 = grad
    wD = jnp.zeros((2 * W * G, OUT * G), jnp.float32)
    bD = jnp.zeros((1, OUT * G), jnp.float32)
    for g in range(G):
        wC = wC.at[g * W:(g + 1) * W, g * 2 * W:g * 2 * W + W].set(params["w3"])
        wC = wC.at[W * G + g * W:W * G + (g + 1) * W,
                   g * 2 * W + W:(g + 1) * 2 * W].set(params["w5"])
        bC = bC.at[:, g * 2 * W:g * 2 * W + W].set(params["b3"])
        bC = bC.at[:, g * 2 * W + W:(g + 1) * 2 * W].set(params["b5"])

        wD = wD.at[g * 2 * W:g * 2 * W + W,
                   g * OUT:g * OUT + out1_dim].set(params["w4"])
        wD = wD.at[g * 2 * W + W:(g + 1) * 2 * W,
                   g * OUT + out1_dim:(g + 1) * OUT].set(params["w6"])
        bD = bD.at[:, g * OUT:g * OUT + out1_dim].set(params["b4"])
        bD = bD.at[:, g * OUT + out1_dim:(g + 1) * OUT].set(params["b6"])

    # weight_dtype=jnp.bfloat16 is available but left off by default per the review
    # (no MXU benefit at these shapes; revisit once packed K/N ~ 256 matters).
    return {
        "wA": wA.astype(weight_dtype), "bA": bA,
        "wB": wB.astype(weight_dtype), "bB": bB,
        "wC": wC.astype(weight_dtype), "bC": bC,
        "wD": wD.astype(weight_dtype), "bD": bD,
        "out1": out1_dim, "out2": out2_dim, "groups": G,
    }


# ----------------------------------------------------------------------------
# Plain-JAX reference mirroring the PyTorch module (near-exact f32 math)
# ----------------------------------------------------------------------------
def reference_forward(x, params):
    def lin(h, w, b):
        return jnp.dot(h, w, preferred_element_type=jnp.float32,
                       precision=jax.lax.Precision.HIGHEST) + b

    h1 = jax.nn.relu(lin(x, params["w1"], params["b1"]))
    h1 = h1 * h1
    h1 = h1 * h1
    h2 = jax.nn.relu(lin(h1, params["w2"], params["b2"]))
    x1 = h2 * h2
    x1 = jax.nn.relu(lin(x1, params["w3"], params["b3"]))
    value = lin(x1, params["w4"], params["b4"])
    x2 = jax.nn.relu(lin(h2, params["w5"], params["b5"]))
    grad = lin(x2, params["w6"], params["b6"])
    return value, grad


def _assert_close(got, want, tol, name):
    # Scale-aware check: tolerant of MXU default-precision differences between the
    # Pallas matmul path and the XLA reference, but far tighter than any structural
    # bug (cross-group leakage / wrong bias mapping would be O(1) relative).
    err = float(jnp.max(jnp.abs(got - want)))
    scale = float(jnp.max(jnp.abs(want))) + 1e-6
    assert err <= tol * scale, f"{name}: max err {err:.3e} vs scale {scale:.3e} (tol {tol})"


if __name__ == "__main__":
    INPUT_DIM, OUTPUT1_DIM, OUTPUT2_DIM, WIDTH = 16, 4, 8, 32
    BATCH = 8

    key = jax.random.PRNGKey(0)
    k_x, k_p = jax.random.split(key)
    x = jax.random.normal(k_x, (BATCH, INPUT_DIM), dtype=jnp.float32)
    params = init_params(k_p, INPUT_DIM, OUTPUT1_DIM, OUTPUT2_DIM, WIDTH)
    ref_value, ref_grad = reference_forward(x, params)

    # --- G=4 packing (v6e/v7x recommendation) -------------------------------
    packed_g4 = pack_params(params, OUTPUT1_DIM, OUTPUT2_DIM, groups=4)
    value, grad = neural_network_mtl(x, packed_g4)
    jax.block_until_ready((value, grad))
    assert value.shape == (BATCH, OUTPUT1_DIM) and grad.shape == (BATCH, OUTPUT2_DIM)
    _assert_close(value, ref_value, 3e-2, "value(G=4)")
    _assert_close(grad, ref_grad, 3e-2, "grad(G=4)")

    # --- G=2 packing (v5e recommendation); cross-check against G=4 ----------
    packed_g2 = pack_params(params, OUTPUT1_DIM, OUTPUT2_DIM, groups=2)
    v2, g2 = neural_network_mtl(x, packed_g2)
    jax.block_until_ready((v2, g2))
    _assert_close(v2, ref_value, 3e-2, "value(G=2)")
    _assert_close(g2, ref_grad, 3e-2, "grad(G=2)")
    _assert_close(v2, value, 1e-3, "value(G=2 vs G=4)")   # same kernel path: tight
    _assert_close(g2, grad, 1e-3, "grad(G=2 vs G=4)")

    # --- larger, non-aligned batch: exercises grid>=2, padding, pack/unpack --
    BIG = 1000
    xb = jax.random.normal(jax.random.PRNGKey(1), (BIG, INPUT_DIM), dtype=jnp.float32)
    vb, gb = neural_network_mtl(xb, packed_g4, block_b=4096)
    jax.block_until_ready((vb, gb))
    rvb, rgb = reference_forward(xb, params)
    assert vb.shape == (BIG, OUTPUT1_DIM) and gb.shape == (BIG, OUTPUT2_DIM)
    _assert_close(vb, rvb, 3e-2, "value(big)")
    _assert_close(gb, rgb, 3e-2, "grad(big)")

    print("KERNEL_OK")
</pallas_src>

<mosaic_0001>
module attributes {stable_mosaic.version = 11 : i64} {
  func.func @mtl_fused_kernel(%arg0: i32, %arg1: memref<8x64xf32, #tpu.memory_space<vmem>>, %arg2: memref<64x128xf32, #tpu.memory_space<vmem>>, %arg3: memref<1x128xf32, #tpu.memory_space<vmem>>, %arg4: memref<128x128xf32, #tpu.memory_space<vmem>>, %arg5: memref<1x128xf32, #tpu.memory_space<vmem>>, %arg6: memref<256x256xf32, #tpu.memory_space<vmem>>, %arg7: memref<1x256xf32, #tpu.memory_space<vmem>>, %arg8: memref<256x48xf32, #tpu.memory_space<vmem>>, %arg9: memref<1x48xf32, #tpu.memory_space<vmem>>, %arg10: memref<8x48xf32, #tpu.memory_space<vmem>>) attributes {dimension_semantics = [#tpu.dimension_semantics<parallel>], iteration_bounds = array<i64: 1>, scalar_prefetch = 0 : i64, scratch_operands = 0 : i64, tpu.core_type = #tpu.core_type<tc>, window_params = [{transform_indices = @transform_0, window_bounds = array<i64: 8, 64>}, {pipeline_mode = #tpu.pipeline_mode<synchronous>, transform_indices = @transform_1, window_bounds = array<i64: 64, 128>}, {pipeline_mode = #tpu.pipeline_mode<synchronous>, transform_indices = @transform_2, window_bounds = array<i64: 1, 128>}, {pipeline_mode = #tpu.pipeline_mode<synchronous>, transform_indices = @transform_3, window_bounds = array<i64: 128, 128>}, {pipeline_mode = #tpu.pipeline_mode<synchronous>, transform_indices = @transform_4, window_bounds = array<i64: 1, 128>}, {pipeline_mode = #tpu.pipeline_mode<synchronous>, transform_indices = @transform_5, window_bounds = array<i64: 256, 256>}, {pipeline_mode = #tpu.pipeline_mode<synchronous>, transform_indices = @transform_6, window_bounds = array<i64: 1, 256>}, {pipeline_mode = #tpu.pipeline_mode<synchronous>, transform_indices = @transform_7, window_bounds = array<i64: 256, 48>}, {pipeline_mode = #tpu.pipeline_mode<synchronous>, transform_indices = @transform_8, window_bounds = array<i64: 1, 48>}, {transform_indices = @transform_9, window_bounds = array<i64: 8, 48>}]} {
    %c0 = arith.constant 0 : index
    %c0_0 = arith.constant 0 : index
    %0 = vector.load %arg1[%c0, %c0_0] : memref<8x64xf32, #tpu.memory_space<vmem>>, vector<8x64xf32>
    %c0_1 = arith.constant 0 : index
    %c0_2 = arith.constant 0 : index
    %1 = vector.load %arg2[%c0_1, %c0_2] : memref<64x128xf32, #tpu.memory_space<vmem>>, vector<64x128xf32>
    %cst = arith.constant dense<0.000000e+00> : vector<8x128xf32>
    %2 = tpu.matmul %0, %1, %cst {dimension_numbers = #tpu.dot_dimension_numbers<[1], [0], [0], [1], [0, 0, 1, 1], [], []>} : vector<8x64xf32>, vector<64x128xf32>, vector<8x128xf32> -> vector<8x128xf32>
    %c0_3 = arith.constant 0 : index
    %c0_4 = arith.constant 0 : index
    %3 = vector.load %arg3[%c0_3, %c0_4] : memref<1x128xf32, #tpu.memory_space<vmem>>, vector<1x128xf32>
    %4 = vector.broadcast %3 : vector<1x128xf32> to vector<8x128xf32>
    %5 = arith.addf %2, %4 : vector<8x128xf32>
    %cst_5 = arith.constant 0.000000e+00 : f32
    %6 = vector.broadcast %cst_5 : f32 to vector<8x128xf32>
    %7 = arith.maximumf %5, %6 : vector<8x128xf32>
    %8 = arith.mulf %7, %7 : vector<8x128xf32>
    %9 = arith.mulf %8, %8 : vector<8x128xf32>
    %c0_6 = arith.constant 0 : index
    %c0_7 = arith.constant 0 : index
    %10 = vector.load %arg4[%c0_6, %c0_7] : memref<128x128xf32, #tpu.memory_space<vmem>>, vector<128x128xf32>
    %cst_8 = arith.constant dense<0.000000e+00> : vector<8x128xf32>
    %11 = tpu.matmul %9, %10, %cst_8 {dimension_numbers = #tpu.dot_dimension_numbers<[1], [0], [0], [1], [0, 0, 1, 1], [], []>} : vector<8x128xf32>, vector<128x128xf32>, vector<8x128xf32> -> vector<8x128xf32>
    %c0_9 = arith.constant 0 : index
    %c0_10 = arith.constant 0 : index
    %12 = vector.load %arg5[%c0_9, %c0_10] : memref<1x128xf32, #tpu.memory_space<vmem>>, vector<1x128xf32>
    %13 = vector.broadcast %12 : vector<1x128xf32> to vector<8x128xf32>
    %14 = arith.addf %11, %13 : vector<8x128xf32>
    %cst_11 = arith.constant 0.000000e+00 : f32
    %15 = vector.broadcast %cst_11 : f32 to vector<8x128xf32>
    %16 = arith.maximumf %14, %15 : vector<8x128xf32>
    %17 = arith.mulf %16, %16 : vector<8x128xf32>
    %18 = tpu.concatenate %17, %16 in 1 : vector<8x128xf32>, vector<8x128xf32> -> vector<8x256xf32>
    %c0_12 = arith.constant 0 : index
    %c0_13 = arith.constant 0 : index
    %19 = vector.load %arg6[%c0_12, %c0_13] : memref<256x256xf32, #tpu.memory_space<vmem>>, vector<256x256xf32>
    %cst_14 = arith.constant dense<0.000000e+00> : vector<8x256xf32>
    %20 = tpu.matmul %18, %19, %cst_14 {dimension_numbers = #tpu.dot_dimension_numbers<[1], [0], [0], [1], [0, 0, 1, 1], [], []>} : vector<8x256xf32>, vector<256x256xf32>, vector<8x256xf32> -> vector<8x256xf32>
    %c0_15 = arith.constant 0 : index
    %c0_16 = arith.constant 0 : index
    %21 = vector.load %arg7[%c0_15, %c0_16] : memref<1x256xf32, #tpu.memory_space<vmem>>, vector<1x256xf32>
    %22 = vector.broadcast %21 : vector<1x256xf32> to vector<8x256xf32>
    %23 = arith.addf %20, %22 : vector<8x256xf32>
    %cst_17 = arith.constant 0.000000e+00 : f32
    %24 = vector.broadcast %cst_17 : f32 to vector<8x256xf32>
    %25 = arith.maximumf %23, %24 : vector<8x256xf32>
    %c0_18 = arith.constant 0 : index
    %c0_19 = arith.constant 0 : index
    %26 = vector.load %arg8[%c0_18, %c0_19] : memref<256x48xf32, #tpu.memory_space<vmem>>, vector<256x48xf32>
    %cst_20 = arith.constant dense<0.000000e+00> : vector<8x48xf32>
    %27 = tpu.matmul %25, %26, %cst_20 {dimension_numbers = #tpu.dot_dimension_numbers<[1], [0], [0], [1], [0, 0, 1, 1], [], []>} : vector<8x256xf32>, vector<256x48xf32>, vector<8x48xf32> -> vector<8x48xf32>
    %c0_21 = arith.constant 0 : index
    %c0_22 = arith.constant 0 : index
    %28 = vector.load %arg9[%c0_21, %c0_22] : memref<1x48xf32, #tpu.memory_space<vmem>>, vector<1x48xf32>
    %29 = vector.broadcast %28 : vector<1x48xf32> to vector<8x48xf32>
    %30 = arith.addf %27, %29 : vector<8x48xf32>
    %c0_23 = arith.constant 0 : index
    %c0_24 = arith.constant 0 : index
    %31 = vector.load %arg10[%c0_23, %c0_24] : memref<8x48xf32, #tpu.memory_space<vmem>>, vector<8x48xf32>
    tpu.vector_store %arg10[%c0_23, %c0_24], %30 {strides = array<i32>} : memref<8x48xf32, #tpu.memory_space<vmem>>, vector<8x48xf32>,
    return
  }
  func.func @transform_0(%arg0: i32) -> (i32, i32) {
    %c0_i32 = arith.constant 0 : i32
    %c0_i32_0 = arith.constant 0 : i32
    return %arg0, %c0_i32 : i32, i32
  }
  func.func @transform_1(%arg0: i32) -> (i32, i32) {
    %c0_i32 = arith.constant 0 : i32
    %c0_i32_0 = arith.constant 0 : i32
    %c0_i32_1 = arith.constant 0 : i32
    return %c0_i32, %c0_i32_0 : i32, i32
  }
  func.func @transform_2(%arg0: i32) -> (i32, i32) {
    %c0_i32 = arith.constant 0 : i32
    %c0_i32_0 = arith.constant 0 : i32
    %c0_i32_1 = arith.constant 0 : i32
    return %c0_i32, %c0_i32_0 : i32, i32
  }
  func.func @transform_3(%arg0: i32) -> (i32, i32) {
    %c0_i32 = arith.constant 0 : i32
    %c0_i32_0 = arith.constant 0 : i32
    %c0_i32_1 = arith.constant 0 : i32
    return %c0_i32, %c0_i32_0 : i32, i32
  }
  func.func @transform_4(%arg0: i32) -> (i32, i32) {
    %c0_i32 = arith.constant 0 : i32
    %c0_i32_0 = arith.constant 0 : i32
    %c0_i32_1 = arith.constant 0 : i32
    return %c0_i32, %c0_i32_0 : i32, i32
  }
  func.func @transform_5(%arg0: i32) -> (i32, i32) {
    %c0_i32 = arith.constant 0 : i32
    %c0_i32_0 = arith.constant 0 : i32
    %c0_i32_1 = arith.constant 0 : i32
    return %c0_i32, %c0_i32_0 : i32, i32
  }
  func.func @transform_6(%arg0: i32) -> (i32, i32) {
    %c0_i32 = arith.constant 0 : i32
    %c0_i32_0 = arith.constant 0 : i32
    %c0_i32_1 = arith.constant 0 : i32
    return %c0_i32, %c0_i32_0 : i32, i32
  }
  func.func @transform_7(%arg0: i32) -> (i32, i32) {
    %c0_i32 = arith.constant 0 : i32
    %c0_i32_0 = arith.constant 0 : i32
    %c0_i32_1 = arith.constant 0 : i32
    return %c0_i32, %c0_i32_0 : i32, i32
  }
  func.func @transform_8(%arg0: i32) -> (i32, i32) {
    %c0_i32 = arith.constant 0 : i32
    %c0_i32_0 = arith.constant 0 : i32
    %c0_i32_1 = arith.constant 0 : i32
    return %c0_i32, %c0_i32_0 : i32, i32
  }
  func.func @transform_9(%arg0: i32) -> (i32, i32) {
    %c0_i32 = arith.constant 0 : i32
    %c0_i32_0 = arith.constant 0 : i32
    return %arg0, %c0_i32 : i32, i32
  }
}

</mosaic_0001>

<bundles_post_ra>
// kernel: tpu_custom_call.1
= control target key start
LH: loop header
LB: loop body
LE: loop exit
PB: predicated region body
PF: predicated region fallthrough
CT: control target
= control target key end

     0   :  { %14 = vsyncpa [#allocation3], 0  ;;  %s950_s0 = inlined_call_operand.vmem [shape: f32[8,64], index: 0, kind: input, shape index: {}]   ;;  %s951_s1 = inlined_call_operand.vmem [shape: f32[64,128], index: 1, kind: input, shape index: {}]   ;;  %s952_s2 = inlined_call_operand.vmem [shape: f32[1,128], index: 2, kind: input, shape index: {}]   ;;  %s953_s3 = inlined_call_operand.vmem [shape: f32[128,128], index: 3, kind: input, shape index: {}]   ;;  %s954_s4 = inlined_call_operand.vmem [shape: f32[1,128], index: 4, kind: input, shape index: {}]   ;;  %s955_s5 = inlined_call_operand.hbm [shape: f32[256,256], index: 5, kind: input, shape index: {}]   ;;  %s956_s6 = inlined_call_operand.vmem [shape: f32[1,256], index: 6, kind: input, shape index: {}]   ;;  %s957_s7 = inlined_call_operand.vmem [shape: f32[256,48], index: 7, kind: input, shape index: {}]   ;;  %s958_s8 = inlined_call_operand.vmem [shape: f32[1,48], index: 8, kind: input, shape index: {}]   ;;  %s959_s9 = inlined_call_operand.hbm [shape: f32[8,48], index: 9, kind: output, shape index: {}]  }
   0x1   :  { %15 = vsyncpa [#allocation4], 0  ;;  %s679_s30 = smov [#allocation2]  }
   0x2   :  { %s31_s10 = sshll.u32 %s679_s30, 4  ;;  %s32_s10 = int_to_ptr.vmem [resolvable:$true] %s31_s10 }
   0x3   :  { %s643_s11 = scalar_lea.vmem %s32_s10, 8192  ;;  %p648_p1 = scmp.lt.s32.totalorder %s32_s10, %s32_s10 }
   0x4   :  { %p644_p0 = scmp.ne.s32.totalorder %s32_s10, %s643_s11  ;;  %p649_p2 = scmp.lt.s32.totalorder %s643_s11, %s643_s11 }
   0x6   :  { %p650_p3 = por %p649_p2, %p648_p1 }
   0x8   :  { %p651_p4 = pnand %p650_p3, %p644_p0 }
   0xa   :  { %654 = shalt.err (!%p651_p4)
}
   0xb   :  { %s680_s12 = smov 256   ;;  %s681_s13 = smov 16  }
   0xc   :  { %37 = dma.hbm_to_vmem [thread:$0]  %s955_s5, 8192, %s32_s10, [#allocation3], %s680_s12, %s680_s12, %s681_s13  }
   0xd   :  { %675 = dma.done.wait [#allocation3], 8192  }
   0xe   :  { %676 = vsyncadd [#allocation3], 4294959104  ;;  %v682_v0 = vmov 0.0   ;;  %vm683_vm0 = vmmov 0   ;;  %v55_v1 = vld [vmem:[%s951_s1 + $0x38] sm:$0xff]  ;;  %v54_v2 = vld [vmem:[%s951_s1 + $0x30] sm:$0xff] }
   0xf   :  { %575 = vmatprep.subr.mxu0 %v682_v0  ;;  %591 = vmatprep.mubr.msk.f32.mxu0 %vm683_vm0, %v682_v0  ;;  %v53_v3 = vld [vmem:[%s951_s1 + $0x28] sm:$0xff]  ;;  %v155_v4 = vld [vmem:[%s953_s3 + $0x78] sm:$0xff]  ;;  %v154_v5 = vld [vmem:[%s953_s3 + $0x70] sm:$0xff]  ;;  %vm63_vm1 = vcmask 523264   ;;  %s684_s12 = smov [#allocation5]   ;;  %vm493_vm2 = vcmask 392192  }
  0x10   :  { %594 = vmatprep.subr.mxu1 %v682_v0  ;;  %626 = vmatprep.mubr.msk.f32.mxu1 %vm683_vm0, %v682_v0  ;;  %v52_v6 = vld [vmem:[%s951_s1 + $0x20] sm:$0xff]  ;;  %v153_v7 = vld [vmem:[%s953_s3 + $0x68] sm:$0xff]  ;;  %v51_v8 = vld [vmem:[%s951_s1 + $0x18] sm:$0xff]  ;;  %s501_s13 = sshll.u32 %s684_s12, 4  ;;  %s502_s13 = int_to_ptr.vmem [resolvable:$true] %s501_s13 }
  0x11   :  { %576 = vmatpush3.msra.mxu0 %v55_v1  ;;  %595 = vmatpush3.msra.mxu1 %v155_v4  ;;  %v152_v9 = vld [vmem:[%s953_s3 + $0x60] sm:$0xff]  ;;  %v50_v10 = vld [vmem:[%s951_s1 + $0x10] sm:$0xff]  ;;  %v151_v11 = vld [vmem:[%s953_s3 + $0x58] sm:$0xff]  ;;  %p660_p6 = scmp.lt.s32.totalorder %s502_s13, %s502_s13 }
  0x12   :  { %577 = vmatprep.subr.mxu0 %v682_v0  ;;  %596 = vmatprep.subr.mxu1 %v682_v0  ;;  %v49_v12 = vld [vmem:[%s951_s1 + $0x8] sm:$0xff]  ;;  %v150_v13 = vld [vmem:[%s953_s3 + $0x50] sm:$0xff]  ;;  %v48_v14 = vld [vmem:[%s951_s1] sm:$0xff] }
  0x13   :  { %578 = vmatpush3.msra.mxu0 %v54_v2  ;;  %597 = vmatpush3.msra.mxu1 %v154_v5  ;;  %v47_v15 = vld [vmem:[%s950_s0] sm:$0xff]  ;;  %v149_v16 = vld [vmem:[%s953_s3 + $0x48] sm:$0xff]  ;;  %v147_v18 = vld [vmem:[%s953_s3 + $0x38] sm:$0xff] }
  0x14   :  { %579 = vmatprep.subr.mxu0 %v682_v0  ;;  %598 = vmatprep.subr.mxu1 %v682_v0  ;;  %v148_v17 = vld [vmem:[%s953_s3 + $0x40] sm:$0xff]  ;;  %v146_v19 = vld [vmem:[%s953_s3 + $0x30] sm:$0xff]  ;;  %v145_v20 = vld [vmem:[%s953_s3 + $0x28] sm:$0xff] }
  0x15   :  { %580 = vmatpush3.msra.mxu0 %v53_v3  ;;  %599 = vmatpush3.msra.mxu1 %v153_v7  ;;  %v144_v21 = vld [vmem:[%s953_s3 + $0x20] sm:$0xff]  ;;  %v143_v22 = vld [vmem:[%s953_s3 + $0x18] sm:$0xff]  ;;  %v142_v23 = vld [vmem:[%s953_s3 + $0x10] sm:$0xff] }
  0x16   :  { %581 = vmatprep.subr.mxu0 %v682_v0  ;;  %600 = vmatprep.subr.mxu1 %v682_v0  ;;  %v141_v24 = vld [vmem:[%s953_s3 + $0x8] sm:$0xff]  ;;  %v140_v25 = vld [vmem:[%s953_s3] sm:$0xff]  ;;  %v266_v26 = vld [vmem:[#allocation2 + $0xf8] sm:$0xff] }
  0x17   :  { %582 = vmatpush3.msra.mxu0 %v52_v6  ;;  %601 = vmatpush3.msra.mxu1 %v152_v9  ;;  %v265_v27 = vld [vmem:[#allocation2 + $0xf0] sm:$0xff]  ;;  %v264_v28 = vld [vmem:[#allocation2 + $0xe8] sm:$0xff]  ;;  %v263_v29 = vld [vmem:[#allocation2 + $0xe0] sm:$0xff] }
  0x18   :  { %583 = vmatprep.subr.mxu0 %v682_v0  ;;  %602 = vmatprep.subr.mxu1 %v682_v0  ;;  %v262_v30 = vld [vmem:[#allocation2 + $0xd8] sm:$0xff]  ;;  %v261_v31 = vld [vmem:[#allocation2 + $0xd0] sm:$0xff]  ;;  %v260_v32 = vld [vmem:[#allocation2 + $0xc8] sm:$0xff] }
  0x19   :  { %584 = vmatpush3.msra.mxu0 %v51_v8  ;;  %603 = vmatpush3.msra.mxu1 %v151_v11  ;;  %v259_v33 = vld [vmem:[#allocation2 + $0xc0] sm:$0xff]  ;;  %v258_v34 = vld [vmem:[#allocation2 + $0xb8] sm:$0xff]  ;;  %v257_v35 = vld [vmem:[#allocation2 + $0xb0] sm:$0xff] }
  0x1a   :  { %585 = vmatprep.subr.mxu0 %v682_v0  ;;  %604 = vmatprep.subr.mxu1 %v682_v0  ;;  %v256_v36 = vld [vmem:[#allocation2 + $0xa8] sm:$0xff]  ;;  %v255_v37 = vld [vmem:[#allocation2 + $0xa0] sm:$0xff]  ;;  %v254_v38 = vld [vmem:[#allocation2 + $0x98] sm:$0xff] }
  0x1b   :  { %586 = vmatpush3.msra.mxu0 %v50_v10  ;;  %605 = vmatpush3.msra.mxu1 %v150_v13  ;;  %v253_v39 = vld [vmem:[#allocation2 + $0x90] sm:$0xff]  ;;  %v252_v40 = vld [vmem:[#allocation2 + $0x88] sm:$0xff]  ;;  %v251_v41 = vld [vmem:[#allocation2 + $0x80] sm:$0xff] }
  0x1c   :  { %587 = vmatprep.subr.mxu0 %v682_v0  ;;  %606 = vmatprep.subr.mxu1 %v682_v0  ;;  %v250_v42 = vld [vmem:[#allocation2 + $0x78] sm:$0xff]  ;;  %v249_v43 = vld [vmem:[#allocation2 + $0x70] sm:$0xff]  ;;  %v248_v44 = vld [vmem:[#allocation2 + $0x68] sm:$0xff] }
  0x1d   :  { %588 = vmatpush3.msra.mxu0 %v49_v12  ;;  %607 = vmatpush3.msra.mxu1 %v149_v16  ;;  %v247_v45 = vld [vmem:[#allocation2 + $0x60] sm:$0xff]  ;;  %v246_v46 = vld [vmem:[#allocation2 + $0x58] sm:$0xff]  ;;  %v245_v47 = vld [vmem:[#allocation2 + $0x50] sm:$0xff] }
  0x1e   :  { %589 = vmatprep.subr.mxu0 %v682_v0  ;;  %608 = vmatprep.subr.mxu1 %v682_v0  ;;  %v244_v48 = vld [vmem:[#allocation2 + $0x48] sm:$0xff]  ;;  %v243_v49 = vld [vmem:[#allocation2 + $0x40] sm:$0xff]  ;;  %v242_v50 = vld [vmem:[#allocation2 + $0x38] sm:$0xff] }
  0x1f   :  { %590 = vmatpush3.msra.mxu0 %v48_v14  ;;  %609 = vmatpush3.msra.mxu1 %v148_v17  ;;  %v241_v51 = vld [vmem:[#allocation2 + $0x30] sm:$0xff]  ;;  %v240_v52 = vld [vmem:[#allocation2 + $0x28] sm:$0xff]  ;;  %v239_v53 = vld [vmem:[#allocation2 + $0x20] sm:$0xff] }
  0x20   :  { %592 = vmatmul.mubr.msk.f32.vlgmr.msra.gmra.mxu0 %vm63_vm1, %v47_v15  ;;  %610 = vmatprep.subr.mxu1 %v682_v0  ;;  %v238_v54 = vld [vmem:[#allocation2 + $0x18] sm:$0xff]  ;;  %v237_v55 = vld [vmem:[#allocation2 + $0x10] sm:$0xff]  ;;  %v236_v56 = vld [vmem:[#allocation2 + $0x8] sm:$0xff] }
  0x21   :  { %611 = vmatpush3.msra.mxu1 %v147_v18  ;;  %311 = vmatprep.subr.mxu0 %v266_v26  ;;  %v235_v57 = vld [vmem:[#allocation2] sm:$0xff]  ;;  %v298_v58 = vld [vmem:[#allocation2 + $0x1f8] sm:$0xff]  ;;  %v297_v59 = vld [vmem:[#allocation2 + $0x1f0] sm:$0xff] }
  0x22   :  { %612 = vmatprep.subr.mxu1 %v682_v0  ;;  %312 = vmatpush1.msra.mxu0 %v265_v27  ;;  %v296_v60 = vld [vmem:[#allocation2 + $0x1e8] sm:$0xff]  ;;  %v295_v61 = vld [vmem:[#allocation2 + $0x1e0] sm:$0xff]  ;;  %v294_v62 = vld [vmem:[#allocation2 + $0x1d8] sm:$0xff] }
  0x23   :  { %613 = vmatpush3.msra.mxu1 %v146_v19  ;;  %313 = vmatprep.subr.mxu0 %v264_v28  ;;  %v293_v63 = vld [vmem:[#allocation2 + $0x1d0] sm:$0xff]  ;;  %v291_v1 = vld [vmem:[#allocation2 + $0x1c0] sm:$0xff]  ;;  %v290_v2 = vld [vmem:[#allocation2 + $0x1b8] sm:$0xff] }
  0x24   :  { %614 = vmatprep.subr.mxu1 %v682_v0  ;;  %314 = vmatpush1.msra.mxu0 %v263_v29  ;;  %v289_v3 = vld [vmem:[#allocation2 + $0x1b0] sm:$0xff]  ;;  %v288_v4 = vld [vmem:[#allocation2 + $0x1a8] sm:$0xff]  ;;  %v287_v5 = vld [vmem:[#allocation2 + $0x1a0] sm:$0xff] }
  0x25   :  { %615 = vmatpush3.msra.mxu1 %v145_v20  ;;  %315 = vmatprep.subr.mxu0 %v262_v30  ;;  %v286_v6 = vld [vmem:[#allocation2 + $0x198] sm:$0xff]  ;;  %v285_v7 = vld [vmem:[#allocation2 + $0x190] sm:$0xff]  ;;  %v284_v8 = vld [vmem:[#allocation2 + $0x188] sm:$0xff] }
  0x26   :  { %616 = vmatprep.subr.mxu1 %v682_v0  ;;  %316 = vmatpush1.msra.mxu0 %v261_v31  ;;  %v283_v9 = vld [vmem:[#allocation2 + $0x180] sm:$0xff]  ;;  %v282_v10 = vld [vmem:[#allocation2 + $0x178] sm:$0xff]  ;;  %v281_v11 = vld [vmem:[#allocation2 + $0x170] sm:$0xff] }
  0x27   :  { %617 = vmatpush3.msra.mxu1 %v144_v21  ;;  %317 = vmatprep.subr.mxu0 %v260_v32  ;;  %v280_v12 = vld [vmem:[#allocation2 + $0x168] sm:$0xff]  ;;  %v279_v13 = vld [vmem:[#allocation2 + $0x160] sm:$0xff]  ;;  %v278_v14 = vld [vmem:[#allocation2 + $0x158] sm:$0xff] }
  0x28   :  { %618 = vmatprep.subr.mxu1 %v682_v0  ;;  %318 = vmatpush1.msra.mxu0 %v259_v33  ;;  %v277_v15 = vld [vmem:[#allocation2 + $0x150] sm:$0xff]  ;;  %v276_v16 = vld [vmem:[#allocation2 + $0x148] sm:$0xff]  ;;  %v275_v17 = vld [vmem:[#allocation2 + $0x140] sm:$0xff] }
  0x29   :  { %619 = vmatpush3.msra.mxu1 %v143_v22  ;;  %319 = vmatprep.subr.mxu0 %v258_v34  ;;  %v274_v18 = vld [vmem:[#allocation2 + $0x138] sm:$0xff]  ;;  %v510_v19 = vld [vmem:[%s952_s2] ss:$0 sm:$0xff]  ;;  %v273_v26 = vld [vmem:[#allocation2 + $0x130] sm:$0xff] }
  0x2a   :  { %620 = vmatprep.subr.mxu1 %v682_v0  ;;  %320 = vmatpush1.msra.mxu0 %v257_v35  ;;  %v272_v27 = vld [vmem:[#allocation2 + $0x128] sm:$0xff]  ;;  %v271_v28 = vld [vmem:[#allocation2 + $0x120] sm:$0xff]  ;;  %v270_v29 = vld [vmem:[#allocation2 + $0x118] sm:$0xff] }
  0x2b   :  { %621 = vmatpush3.msra.mxu1 %v142_v23  ;;  %321 = vmatprep.subr.mxu0 %v256_v36  ;;  %v269_v30 = vld [vmem:[#allocation2 + $0x110] sm:$0xff]  ;;  %v268_v31 = vld [vmem:[#allocation2 + $0x108] sm:$0xff]  ;;  %v267_v32 = vld [vmem:[#allocation2 + $0x100] sm:$0xff] }
  0x2c   :  { %622 = vmatprep.subr.mxu1 %v682_v0  ;;  %322 = vmatpush1.msra.mxu0 %v255_v37  ;;  %v415_v33 = vld [vmem:[%s957_s7 + $0xf8] sm:$0xff]  ;;  %v414_v35 = vld [vmem:[%s957_s7 + $0xf0] sm:$0xff]  ;;  %v413_v37 = vld [vmem:[%s957_s7 + $0xe8] sm:$0xff] }
  0x2d   :  { %623 = vmatpush3.msra.mxu1 %v141_v24  ;;  %323 = vmatprep.subr.mxu0 %v254_v38  ;;  %v399_v34 = vld [vmem:[%s957_s7 + $0x78] sm:$0xff]  ;;  %v398_v36 = vld [vmem:[%s957_s7 + $0x70] sm:$0xff]  ;;  %v397_v38 = vld [vmem:[%s957_s7 + $0x68] sm:$0xff] }
  0x2e   :  { %624 = vmatprep.subr.mxu1 %v682_v0  ;;  %324 = vmatpush1.msra.mxu0 %v253_v39  ;;  %v292_v0 = vld [vmem:[#allocation2 + $0x1c8] sm:$0xff]  ;;  %v412_v39 = vld [vmem:[%s957_s7 + $0xe0] sm:$0xff] }
  0x2f   :  { %625 = vmatpush3.msra.mxu1 %v140_v25  ;;  %325 = vmatprep.subr.mxu0 %v252_v40  ;;  %v396_v40 = vld [vmem:[%s957_s7 + $0x60] sm:$0xff] }
  0x30   :  { %326 = vmatpush1.msra.mxu0 %v251_v41  ;;  %540 = vmatprep.subr.mxu1 %v415_v33  ;;  %v411_v41 = vld [vmem:[%s957_s7 + $0xd8] sm:$0xff] }
  0x31   :  { %327 = vmatprep.subr.mxu0 %v250_v42  ;;  %v395_v42 = vld [vmem:[%s957_s7 + $0x58] sm:$0xff] }
  0x32   :  { %328 = vmatpush1.msra.mxu0 %v249_v43  ;;  %v410_v43 = vld [vmem:[%s957_s7 + $0xd0] sm:$0xff] }
  0x33   :  { %329 = vmatprep.subr.mxu0 %v248_v44  ;;  %v394_v44 = vld [vmem:[%s957_s7 + $0x50] sm:$0xff] }
  0x34   :  { %330 = vmatpush1.msra.mxu0 %v247_v45  ;;  %v409_v45 = vld [vmem:[%s957_s7 + $0xc8] sm:$0xff] }
  0x35   :  { %331 = vmatprep.subr.mxu0 %v246_v46  ;;  %v393_v46 = vld [vmem:[%s957_s7 + $0x48] sm:$0xff] }
  0x36   :  { %332 = vmatpush1.msra.mxu0 %v245_v47  ;;  %v408_v47 = vld [vmem:[%s957_s7 + $0xc0] sm:$0xff] }
  0x37   :  { %333 = vmatprep.subr.mxu0 %v244_v48  ;;  %v392_v48 = vld [vmem:[%s957_s7 + $0x40] sm:$0xff] }
  0x38   :  { %334 = vmatpush1.msra.mxu0 %v243_v49  ;;  %v407_v49 = vld [vmem:[%s957_s7 + $0xb8] sm:$0xff] }
  0x39   :  { %335 = vmatprep.subr.mxu0 %v242_v50  ;;  %v391_v50 = vld [vmem:[%s957_s7 + $0x38] sm:$0xff] }
  0x3a   :  { %336 = vmatpush1.msra.mxu0 %v241_v51  ;;  %v406_v51 = vld [vmem:[%s957_s7 + $0xb0] sm:$0xff] }
  0x3b   :  { %337 = vmatprep.subr.mxu0 %v240_v52  ;;  %v390_v52 = vld [vmem:[%s957_s7 + $0x30] sm:$0xff] }
  0x3c   :  { %338 = vmatpush1.msra.mxu0 %v239_v53  ;;  %v405_v53 = vld [vmem:[%s957_s7 + $0xa8] sm:$0xff] }
  0x3d   :  { %339 = vmatprep.subr.mxu0 %v238_v54  ;;  %v389_v54 = vld [vmem:[%s957_s7 + $0x28] sm:$0xff] }
  0x3e   :  { %340 = vmatpush1.msra.mxu0 %v237_v55  ;;  %v404_v55 = vld [vmem:[%s957_s7 + $0xa0] sm:$0xff] }
  0x3f   :  { %341 = vmatprep.subr.mxu0 %v236_v56  ;;  %v388_v56 = vld [vmem:[%s957_s7 + $0x20] sm:$0xff] }
  0x40   :  { %342 = vmatpush1.msra.mxu0 %v235_v57  ;;  %v512_v57 = vld [vmem:[%s954_s4] ss:$0 sm:$0xff] }
  0x41   :  { %343 = vmatprep.subr.mxu0 %v298_v58 }
  0x42   :  { %344 = vmatpush2.msra.mxu0 %v297_v59 }
  0x43   :  { %345 = vmatprep.subr.mxu0 %v296_v60 }
  0x44   :  { %346 = vmatpush2.msra.mxu0 %v295_v61 }
  0x45   :  { %347 = vmatprep.subr.mxu0 %v294_v62 }
  0x46   :  { %348 = vmatpush2.msra.mxu0 %v293_v63  ;;  %v403_v63 = vld [vmem:[%s957_s7 + $0x98] sm:$0xff] }
  0x47   :  { %349 = vmatprep.subr.mxu0 %v292_v0  ;;  %v387_v0 = vld [vmem:[%s957_s7 + $0x18] sm:$0xff] }
  0x48   :  { %350 = vmatpush2.msra.mxu0 %v291_v1  ;;  %v402_v1 = vld [vmem:[%s957_s7 + $0x90] sm:$0xff] }
  0x49   :  { %351 = vmatprep.subr.mxu0 %v290_v2  ;;  %v386_v2 = vld [vmem:[%s957_s7 + $0x10] sm:$0xff] }
  0x4a   :  { %352 = vmatpush2.msra.mxu0 %v289_v3  ;;  %v401_v3 = vld [vmem:[%s957_s7 + $0x88] sm:$0xff] }
  0x4b   :  { %353 = vmatprep.subr.mxu0 %v288_v4  ;;  %v385_v4 = vld [vmem:[%s957_s7 + $0x8] sm:$0xff] }
  0x4c   :  { %354 = vmatpush2.msra.mxu0 %v287_v5  ;;  %v400_v5 = vld [vmem:[%s957_s7 + $0x80] sm:$0xff] }
  0x4d   :  { %355 = vmatprep.subr.mxu0 %v286_v6  ;;  %v384_v6 = vld [vmem:[%s957_s7] sm:$0xff] }
  0x4e   :  { %356 = vmatpush2.msra.mxu0 %v285_v7  ;;  %v301_v7 = vlaneseq }
  0x4f   :  { %357 = vmatprep.subr.mxu0 %v284_v8 }
  0x50   :  { %358 = vmatpush2.msra.mxu0 %v283_v9  ;;  %v302_v8 = vshrl.u32 %v301_v7, 7 }
  0x51   :  { %359 = vmatprep.subr.mxu0 %v282_v10  ;;  %v299_v10 = vld [vmem:[%s956_s6] sm:$0x3]  ;;  %s655_s6 = scalar_lea.vmem %s502_s13, 128 }
  0x52   :  { %360 = vmatpush2.msra.mxu0 %v281_v11  ;;  %v303_v9 = vsub.s32 0, %v302_v8  ;;  %v307_v11 = vsub.s32 1, %v302_v8  ;;  %p656_p5 = scmp.ne.s32.totalorder %s502_s13, %s655_s6  ;;  %p661_p7 = scmp.lt.s32.totalorder %s655_s6, %s655_s6 }
  0x53   :  { %361 = vmatprep.subr.mxu0 %v280_v12 }
  0x54   :  { %362 = vmatpush2.msra.mxu0 %v279_v13  ;;  %v304_v12 = vrot.slane %v299_v10, %v303_v9  ;;  %v308_v13 = vrot.slane %v299_v10, %v307_v11  ;;  %p662_p8 = por %p661_p7, %p660_p6 }
  0x55   :  { %363 = vmatprep.subr.mxu0 %v278_v14 }
  0x56   :  { %364 = vmatpush2.msra.mxu0 %v277_v15  ;;  %p663_p9 = pnand %p662_p8, %p656_p5 }
  0x57   :  { %365 = vmatprep.subr.mxu0 %v276_v16 }
  0x58   :  { %366 = vmatpush2.msra.mxu0 %v275_v17 }
  0x59   :  { %367 = vmatprep.subr.mxu0 %v274_v18 }
  0x5a   :  { %368 = vmatpush2.msra.mxu0 %v273_v26 }
  0x5b   :  { %369 = vmatprep.subr.mxu0 %v272_v27 }
  0x5c   :  { %370 = vmatpush2.msra.mxu0 %v271_v28 }
  0x5d   :  { %371 = vmatprep.subr.mxu0 %v270_v29 }
  0x5e   :  { %372 = vmatpush2.msra.mxu0 %v269_v30 }
  0x5f   :  { %373 = vmatprep.subr.mxu0 %v268_v31 }
  0x60   :  { %374 = vmatpush2.msra.mxu0 %v267_v32 }
  0xe0   :  { %v133_v20 = vpop.f32.mrf.mxu0 }
  0xe1   :  { %v134_v21 = vadd.f32 %v510_v19, %v133_v20 }
  0xe2   :  { %v593_v22 = vpop.f32.mrf.mxu0 }
  0xe3   :  { %v137_v23 = vmax.f32 %v134_v21, 0.0  ;;  %v513_v21 = vld [vmem:[%s958_s8] ss:$0 sm:$0xff] }
  0xe5   :  { %v138_v24 = vmul.f32 %v137_v23, %v137_v23 }
  0xe7   :  { %v139_v25 = vmul.f32 %v138_v24, %v138_v24 }
  0xe9   :  { %627 = vmatmul.mubr.f32.vlgmr.msra.gmra.mxu1 %v139_v25 }
  0xea   :  { %541 = vmatpush3.msra.mxu1 %v399_v34 }
  0xeb   :  { %542 = vmatprep.subr.mxu1 %v414_v35 }
  0xec   :  { %543 = vmatpush3.msra.mxu1 %v398_v36 }
  0xed   :  { %544 = vmatprep.subr.mxu1 %v413_v37 }
  0xee   :  { %545 = vmatpush3.msra.mxu1 %v397_v38 }
  0xef   :  { %546 = vmatprep.subr.mxu1 %v412_v39 }
  0xf0   :  { %547 = vmatpush3.msra.mxu1 %v396_v40 }
  0xf1   :  { %548 = vmatprep.subr.mxu1 %v411_v41 }
  0xf2   :  { %549 = vmatpush3.msra.mxu1 %v395_v42 }
  0xf3   :  { %550 = vmatprep.subr.mxu1 %v410_v43 }
  0xf4   :  { %551 = vmatpush3.msra.mxu1 %v394_v44 }
  0xf5   :  { %552 = vmatprep.subr.mxu1 %v409_v45 }
  0xf6   :  { %553 = vmatpush3.msra.mxu1 %v393_v46 }
  0xf7   :  { %554 = vmatprep.subr.mxu1 %v408_v47 }
  0xf8   :  { %555 = vmatpush3.msra.mxu1 %v392_v48 }
  0xf9   :  { %556 = vmatprep.subr.mxu1 %v407_v49 }
  0xfa   :  { %557 = vmatpush3.msra.mxu1 %v391_v50 }
  0xfb   :  { %558 = vmatprep.subr.mxu1 %v406_v51 }
  0xfc   :  { %559 = vmatpush3.msra.mxu1 %v390_v52 }
  0xfd   :  { %560 = vmatprep.subr.mxu1 %v405_v53 }
  0xfe   :  { %561 = vmatpush3.msra.mxu1 %v389_v54 }
  0xff   :  { %562 = vmatprep.subr.mxu1 %v404_v55 }
 0x100   :  { %563 = vmatpush3.msra.mxu1 %v388_v56 }
 0x101   :  { %564 = vmatprep.subr.mxu1 %v403_v63 }
 0x102   :  { %565 = vmatpush3.msra.mxu1 %v387_v0 }
 0x103   :  { %566 = vmatprep.subr.mxu1 %v402_v1 }
 0x104   :  { %567 = vmatpush3.msra.mxu1 %v386_v2 }
 0x105   :  { %568 = vmatprep.subr.mxu1 %v401_v3 }
 0x106   :  { %569 = vmatpush3.msra.mxu1 %v385_v4 }
 0x107   :  { %570 = vmatprep.subr.mxu1 %v400_v5 }
 0x108   :  { %571 = vmatpush3.msra.mxu1 %v384_v6 }
 0x1a9   :  { %v229_v58 = vpop.f32.mrf.mxu1 }
 0x1aa   :  { %v230_v59 = vadd.f32 %v512_v57, %v229_v58 }
 0x1ab   :  { %v628_v60 = vpop.f32.mrf.mxu1 }
 0x1ac   :  { %v233_v61 = vmax.f32 %v230_v59, 0.0 }
 0x1ae   :  { %v234_v62 = vmul.f32 %v233_v61, %v233_v61  ;;  %375 = vmatprep.mubr.f32.mxu0 %v233_v61 }
 0x1b0   :  { %376 = vmatmul.mubr.f32.vlgmr.msra.gmra.mxu0 %v234_v62 }
 0x270   :  { %v377_v14 = vpop.f32.mrf.mxu0 }
 0x271   :  { %v378_v15 = vadd.f32 %v377_v14, %v304_v12 }
 0x272   :  { %v379_v16 = vpop.f32.mrf.mxu0 }
 0x273   :  { %v380_v17 = vadd.f32 %v379_v16, %v308_v13  ;;  %v382_v19 = vmax.f32 %v378_v15, 0.0 }
 0x275   :  { %v383_v18 = vmax.f32 %v380_v17, 0.0 }
 0x277   :  { %487 = vmatprep.mubr.f32.mxu1 %v383_v18 }
 0x278   :  { %488 = vmatmul.mubr.f32.vlgmr.msra.gmra.mxu1 %v382_v19 }
 0x338   :  { %v572_v20 = vpop.f32.mrf.mxu1 }
 0x33a   :  { %v573_v22 = vpop.f32.mrf.mxu1 }
 0x33b   :  { %v574_v23 = vadd.f32 %v573_v22, %v572_v20 }
 0x33d   :  { %v490_v24 = vadd.f32 %v574_v23, %v513_v21 }
 0x33f   :  { %494 = vst.msk [vmem:[#allocation5] sm:$0xff] %vm493_vm2, %v490_v24 }
 0x340   :  { %666 = shalt.err (!%p663_p9)
}
 0x341   :  { %504 = dma.vmem_to_hbm [thread:$0]  %s502_s13, 128, %s959_s9, [#allocation4]  }
 0x342   :  { %677 = dma.done.wait [#allocation4], 128  }
 0x343   :  { %678 = vsyncadd [#allocation4], 4294967168 }
 0x344   :  { %508 = vsyncpa [#allocation3], 1 }
 0x345   :  { %509 = vsyncpa [#allocation4], 1 }

</bundles_post_ra>
